<compile_context>
chip_gen: v5e
topology: v5e:2x2
jax: 0.10.0
libtpu: 0.0.40
codegen_flags: <defaults>
</compile_context>

<pallas_src>
import functools

import jax
import jax.numpy as jnp
from jax.experimental import pallas as pl
from jax.experimental.pallas import tpu as pltpu

LN_EPS = 1e-5
H1, H2 = 400, 300          # true hidden dims (PyTorch Linear sizes)
H1P, H2P = 512, 384        # lane-padded hidden dims (multiples of 128)


def _round_up(x, m):
    return ((x + m - 1) // m) * m


def _cdiv(a, b):
    return -(-a // b)


def _masked_layernorm(x, gamma, beta, mask, n_valid):
    """LayerNorm over the last (lane-padded) dim.

    Padded lanes of `x` are exactly zero (padded weight cols / bias lanes are zero), so
    the mean needs no mask (divide by the true count).  The variance multiplies the
    squared-centered values by a precomputed 0/1 lane mask (one extra VPU mul per vreg;
    no iota/compare/select).  gamma/beta are zero on padded lanes, so the affine output
    is exactly zero there, keeping downstream matmuls exact.
    """
    inv_n = 1.0 / float(n_valid)
    mean = jnp.sum(x, axis=-1, keepdims=True) * inv_n
    centered = x - mean
    var = jnp.sum(centered * centered * mask, axis=-1, keepdims=True) * inv_n
    return centered * jax.lax.rsqrt(var + LN_EPS) * gamma + beta


def critic_kernel(
    sa_ref,                            # (TB, D+A+1) bf16: [state | action | 1]
    wbig_ref,                          # (D+A+1, H1P+H2P) bf16: [[W1,0],[0,Wa],[b1,ba]]
    g1_ref, be1_ref, m1_ref,           # (1, H1P) fp32
    w2_ref,                            # (H1P, H2P) bf16
    b2_ref, g2_ref, be2_ref, m2_ref,   # (1, H2P) fp32
    w3_ref,                            # (1, H2P) fp32  (fc3 weight as a row)
    b3_ref,                            # (1, 1)   fp32
    out_ref,                           # (TB, 1)  fp32
    *, h1p, h1_valid, h2_valid,
):
    # One bf16 MXU pass computes fc1 AND the action branch (biases folded via the
    # trailing ones-column of the input), fp32 accumulation.
    xa = jnp.dot(sa_ref[...], wbig_ref[...], preferred_element_type=jnp.float32)
    x = xa[:, :h1p]                    # state  @ W1 + b1  (lane-aligned static slice)
    av = xa[:, h1p:]                   # action @ Wa + ba

    # LayerNorm(400) + relu  (fp32 VPU math)
    x = _masked_layernorm(x, g1_ref[...], be1_ref[...], m1_ref[...], h1_valid)
    x = jnp.maximum(x, 0.0)

    # fc2 (bf16 MXU, fp32 accum) + LayerNorm(300)
    x = jnp.dot(x.astype(jnp.bfloat16), w2_ref[...],
                preferred_element_type=jnp.float32) + b2_ref[...]
    x = _masked_layernorm(x, g2_ref[...], be2_ref[...], m2_ref[...], h2_valid)

    # fuse with action branch, relu, N=1 projection as VPU mul + lane reduce
    sav = jnp.maximum(x + av, 0.0)
    out = jnp.sum(sav * w3_ref[...], axis=-1, keepdims=True) + b3_ref[...]
    out_ref[...] = out.astype(out_ref.dtype)


@functools.partial(jax.jit, static_argnames=("tb",))
def critic_forward(state, action, params, tb=512):
    """state: (B, input_dim) fp32, action: (B, n_actions) fp32, params: prepare_params()."""
    B, D = state.shape
    A = action.shape[1]

    # [state | action | 1] so fc1 / action-branch biases ride inside the matmul.
    ones = jnp.ones((B, 1), jnp.float32)
    sa = jnp.concatenate([state, action, ones], axis=-1).astype(jnp.bfloat16)

    # Batch tiling: minimize padding waste, amortize per-step overhead, and prefer
    # >=2 tiles once B is big enough so a 2-TC chip (v7x) shards the batch axis.
    nt = _cdiv(B, tb)
    if nt == 1 and B >= 128:
        nt = 2
    tb_eff = _round_up(_cdiv(B, nt), 8)
    b_pad = nt * tb_eff
    if b_pad != B:
        sa = jnp.pad(sa, ((0, b_pad - B), (0, 0)))

    def tiled(cols):                       # batch-tiled operand
        return pl.BlockSpec((tb_eff, cols), lambda i: (i, 0))

    def resident(arr):                     # weights: same block every step -> DMA'd once
        return pl.BlockSpec(arr.shape, lambda i: (0, 0))

    weights = (
        params["w_big"],
        params["g1"], params["be1"], params["mask1"],
        params["w2"],
        params["b2"], params["g2"], params["be2"], params["mask2"],
        params["w3"], params["b3"],
    )

    kernel = functools.partial(critic_kernel, h1p=H1P, h1_valid=H1, h2_valid=H2)

    out = pl.pallas_call(
        kernel,
        out_shape=jax.ShapeDtypeStruct((b_pad, 1), jnp.float32),
        grid=(nt,),
        in_specs=[tiled(D + A + 1)] + [resident(w) for w in weights],
        out_specs=pl.BlockSpec((tb_eff, 1), lambda i: (i, 0)),
        compiler_params=pltpu.CompilerParams(
            dimension_semantics=("parallel",),
        ),
    )(sa, *weights)

    return out[:B]


def init_params(key, input_dim, n_actions):
    """Unpadded fp32 params mirroring initialize_weights_bias (weights stored [in, out])."""
    ks = jax.random.split(key, 8)
    f1 = 1.0 / jnp.sqrt(400.0)           # 1/sqrt(fc1.weight.size(0))
    f2 = 1.0 / jnp.sqrt(300.0)
    f3 = 0.003
    f4 = 1.0 / jnp.sqrt(300.0)

    def u(k, shape, lim):
        return jax.random.uniform(k, shape, jnp.float32, -lim, lim)

    return {
        "w1": u(ks[0], (input_dim, H1), f1),
        "b1": u(ks[1], (1, H1), f1),
        "g1": jnp.ones((1, H1), jnp.float32),
        "be1": jnp.zeros((1, H1), jnp.float32),
        "w2": u(ks[2], (H1, H2), f2),
        "b2": u(ks[3], (1, H2), f2),
        "g2": jnp.ones((1, H2), jnp.float32),
        "be2": jnp.zeros((1, H2), jnp.float32),
        "wa": u(ks[4], (n_actions, H2), f4),
        "ba": u(ks[5], (1, H2), f4),
        "w3": u(ks[6], (H2, 1), f3),
        "b3": u(ks[7], (1, 1), f3),
    }


def prepare_params(p):
    """Kernel-ready params: hidden dims zero-padded to lane multiples of 128, fc1/action
    weights + biases packed into one block matrix, matmul weights cast to bf16 (the
    kernel accumulates in fp32); LayerNorm params, lane masks and fc3 stay fp32."""
    D = p["w1"].shape[0]
    A = p["wa"].shape[0]
    f32 = jnp.float32

    def pad_c(a, tc):
        return jnp.pad(a, ((0, 0), (0, tc - a.shape[1])))

    w1 = pad_c(p["w1"], H1P)
    b1 = pad_c(p["b1"], H1P)
    wa = pad_c(p["wa"], H2P)
    ba = pad_c(p["ba"], H2P)
    w_big = jnp.concatenate([
        jnp.concatenate([w1, jnp.zeros((D, H2P), f32)], axis=1),
        jnp.concatenate([jnp.zeros((A, H1P), f32), wa], axis=1),
        jnp.concatenate([b1, ba], axis=1),
    ], axis=0).astype(jnp.bfloat16)                          # (D+A+1, H1P+H2P)

    w2 = jnp.pad(p["w2"], ((0, H1P - H1), (0, H2P - H2))).astype(jnp.bfloat16)

    mask1 = (jnp.arange(H1P) < H1).astype(f32)[None, :]
    mask2 = (jnp.arange(H2P) < H2).astype(f32)[None, :]

    return {
        "w_big": w_big,
        "g1": pad_c(p["g1"], H1P), "be1": pad_c(p["be1"], H1P), "mask1": mask1,
        "w2": w2,
        "b2": pad_c(p["b2"], H2P),
        "g2": pad_c(p["g2"], H2P), "be2": pad_c(p["be2"], H2P), "mask2": mask2,
        "w3": pad_c(p["w3"].T, H2P),      # (1, H2P) row for VPU mul + lane reduce
        "b3": p["b3"],                    # (1, 1)
    }


def reference_forward(state, action, p, matmul_dtype=jnp.float32):
    """Pure-JAX reference.  matmul_dtype=bf16 mirrors the kernel's deliberate bf16
    matmul / fp32-accumulation math; fp32 gives the exact PyTorch semantics."""
    md = matmul_dtype
    f32 = jnp.float32

    def ln(x, g, b):
        mean = jnp.mean(x, axis=-1, keepdims=True)
        c = x - mean
        var = jnp.mean(c * c, axis=-1, keepdims=True)
        return c * jax.lax.rsqrt(var + LN_EPS) * g + b

    x = jnp.dot(state.astype(md), p["w1"].astype(md),
                preferred_element_type=f32) + p["b1"].astype(md).astype(f32)
    x = ln(x, p["g1"], p["be1"])
    x = jnp.maximum(x, 0.0)
    x = jnp.dot(x.astype(md), p["w2"].astype(md),
                preferred_element_type=f32) + p["b2"]
    x = ln(x, p["g2"], p["be2"])
    av = jnp.dot(action.astype(md), p["wa"].astype(md),
                 preferred_element_type=f32) + p["ba"].astype(md).astype(f32)
    sav = jnp.maximum(x + av, 0.0)
    return sav @ p["w3"] + p["b3"]


if __name__ == "__main__":
    key = jax.random.PRNGKey(0)
    k_state, k_action, k_params = jax.random.split(key, 3)

    batch, input_dim, n_actions = 2, 8, 4   # input_dims=(8,), n_actions=4
    state = jax.random.normal(k_state, (batch, input_dim), jnp.float32)
    action = jax.random.normal(k_action, (batch, n_actions), jnp.float32)

    params = init_params(k_params, input_dim, n_actions)
    kparams = prepare_params(params)

    out = jax.block_until_ready(critic_forward(state, action, kparams))
    assert out.shape == (batch, 1), out.shape

    # Tight check vs. a reference using the same bf16-matmul / fp32-accum math.
    ref_bf16 = reference_forward(state, action, params, matmul_dtype=jnp.bfloat16)
    assert jnp.allclose(out, ref_bf16, atol=1e-3, rtol=1e-3), (out, ref_bf16)

    # Loose check vs. exact fp32 PyTorch semantics (difference is only bf16 matmul noise).
    ref_f32 = reference_forward(state, action, params, matmul_dtype=jnp.float32)
    assert jnp.allclose(out, ref_f32, atol=3e-2, rtol=3e-2), (out, ref_f32)

    print("KERNEL_OK")
</pallas_src>

<mosaic_0001>
module attributes {stable_mosaic.version = 11 : i64} {
  func.func @critic_kernel(%arg0: i32, %arg1: memref<8x13xbf16, #tpu.memory_space<vmem>>, %arg2: memref<13x896xbf16, #tpu.memory_space<vmem>>, %arg3: memref<1x512xf32, #tpu.memory_space<vmem>>, %arg4: memref<1x512xf32, #tpu.memory_space<vmem>>, %arg5: memref<1x512xf32, #tpu.memory_space<vmem>>, %arg6: memref<512x384xbf16, #tpu.memory_space<vmem>>, %arg7: memref<1x384xf32, #tpu.memory_space<vmem>>, %arg8: memref<1x384xf32, #tpu.memory_space<vmem>>, %arg9: memref<1x384xf32, #tpu.memory_space<vmem>>, %arg10: memref<1x384xf32, #tpu.memory_space<vmem>>, %arg11: memref<1x384xf32, #tpu.memory_space<vmem>>, %arg12: memref<1x1xf32, #tpu.memory_space<vmem>>, %arg13: memref<8x1xf32, #tpu.memory_space<vmem>>) attributes {dimension_semantics = [#tpu.dimension_semantics<parallel>], iteration_bounds = array<i64: 1>, scalar_prefetch = 0 : i64, scratch_operands = 0 : i64, tpu.core_type = #tpu.core_type<tc>, window_params = [{transform_indices = @transform_0, window_bounds = array<i64: 8, 13>}, {pipeline_mode = #tpu.pipeline_mode<synchronous>, transform_indices = @transform_1, window_bounds = array<i64: 13, 896>}, {pipeline_mode = #tpu.pipeline_mode<synchronous>, transform_indices = @transform_2, window_bounds = array<i64: 1, 512>}, {pipeline_mode = #tpu.pipeline_mode<synchronous>, transform_indices = @transform_3, window_bounds = array<i64: 1, 512>}, {pipeline_mode = #tpu.pipeline_mode<synchronous>, transform_indices = @transform_4, window_bounds = array<i64: 1, 512>}, {pipeline_mode = #tpu.pipeline_mode<synchronous>, transform_indices = @transform_5, window_bounds = array<i64: 512, 384>}, {pipeline_mode = #tpu.pipeline_mode<synchronous>, transform_indices = @transform_6, window_bounds = array<i64: 1, 384>}, {pipeline_mode = #tpu.pipeline_mode<synchronous>, transform_indices = @transform_7, window_bounds = array<i64: 1, 384>}, {pipeline_mode = #tpu.pipeline_mode<synchronous>, transform_indices = @transform_8, window_bounds = array<i64: 1, 384>}, {pipeline_mode = #tpu.pipeline_mode<synchronous>, transform_indices = @transform_9, window_bounds = array<i64: 1, 384>}, {pipeline_mode = #tpu.pipeline_mode<synchronous>, transform_indices = @transform_10, window_bounds = array<i64: 1, 384>}, {pipeline_mode = #tpu.pipeline_mode<synchronous>, transform_indices = @transform_11, window_bounds = array<i64: 1, 1>}, {transform_indices = @transform_12, window_bounds = array<i64: 8, 1>}]} {
    %c0 = arith.constant 0 : index
    %c0_0 = arith.constant 0 : index
    %0 = vector.load %arg1[%c0, %c0_0] : memref<8x13xbf16, #tpu.memory_space<vmem>>, vector<8x13xbf16>
    %c0_1 = arith.constant 0 : index
    %c0_2 = arith.constant 0 : index
    %1 = vector.load %arg2[%c0_1, %c0_2] : memref<13x896xbf16, #tpu.memory_space<vmem>>, vector<13x896xbf16>
    %cst = arith.constant dense<0.000000e+00> : vector<8x896xf32>
    %2 = tpu.matmul %0, %1, %cst {dimension_numbers = #tpu.dot_dimension_numbers<[1], [0], [0], [1], [0, 0, 1, 1], [], []>} : vector<8x13xbf16>, vector<13x896xbf16>, vector<8x896xf32> -> vector<8x896xf32>
    %3 = vector.extract_strided_slice %2 {offsets = [0, 0], sizes = [8, 512], strides = [1, 1]} : vector<8x896xf32> to vector<8x512xf32>
    %4 = vector.extract_strided_slice %2 {offsets = [0, 512], sizes = [8, 384], strides = [1, 1]} : vector<8x896xf32> to vector<8x384xf32>
    %c0_3 = arith.constant 0 : index
    %c0_4 = arith.constant 0 : index
    %5 = vector.load %arg3[%c0_3, %c0_4] : memref<1x512xf32, #tpu.memory_space<vmem>>, vector<1x512xf32>
    %c0_5 = arith.constant 0 : index
    %c0_6 = arith.constant 0 : index
    %6 = vector.load %arg4[%c0_5, %c0_6] : memref<1x512xf32, #tpu.memory_space<vmem>>, vector<1x512xf32>
    %c0_7 = arith.constant 0 : index
    %c0_8 = arith.constant 0 : index
    %7 = vector.load %arg5[%c0_7, %c0_8] : memref<1x512xf32, #tpu.memory_space<vmem>>, vector<1x512xf32>
    %cst_9 = arith.constant dense<0.000000e+00> : vector<8xf32>
    %8 = vector.multi_reduction <add>, %3, %cst_9 [1] : vector<8x512xf32> to vector<8xf32>
    %9 = vector.shape_cast %8 : vector<8xf32> to vector<8x1xf32>
    %cst_10 = arith.constant 2.500000e-03 : f32
    %10 = vector.broadcast %cst_10 : f32 to vector<8x1xf32>
    %11 = arith.mulf %9, %10 : vector<8x1xf32>
    %12 = vector.broadcast %11 : vector<8x1xf32> to vector<8x512xf32>
    %13 = arith.subf %3, %12 : vector<8x512xf32>
    %14 = arith.mulf %13, %13 : vector<8x512xf32>
    %15 = vector.broadcast %7 : vector<1x512xf32> to vector<8x512xf32>
    %16 = arith.mulf %14, %15 : vector<8x512xf32>
    %cst_11 = arith.constant dense<0.000000e+00> : vector<8xf32>
    %17 = vector.multi_reduction <add>, %16, %cst_11 [1] : vector<8x512xf32> to vector<8xf32>
    %18 = vector.shape_cast %17 : vector<8xf32> to vector<8x1xf32>
    %cst_12 = arith.constant 2.500000e-03 : f32
    %19 = vector.broadcast %cst_12 : f32 to vector<8x1xf32>
    %20 = arith.mulf %18, %19 : vector<8x1xf32>
    %cst_13 = arith.constant 9.99999974E-6 : f32
    %21 = vector.broadcast %cst_13 : f32 to vector<8x1xf32>
    %22 = arith.addf %20, %21 : vector<8x1xf32>
    %23 = math.rsqrt %22 : vector<8x1xf32>
    %24 = vector.broadcast %23 : vector<8x1xf32> to vector<8x512xf32>
    %25 = arith.mulf %13, %24 : vector<8x512xf32>
    %26 = vector.broadcast %5 : vector<1x512xf32> to vector<8x512xf32>
    %27 = arith.mulf %25, %26 : vector<8x512xf32>
    %28 = vector.broadcast %6 : vector<1x512xf32> to vector<8x512xf32>
    %29 = arith.addf %27, %28 : vector<8x512xf32>
    %cst_14 = arith.constant 0.000000e+00 : f32
    %30 = vector.broadcast %cst_14 : f32 to vector<8x512xf32>
    %31 = arith.maximumf %29, %30 : vector<8x512xf32>
    %32 = arith.truncf %31 : vector<8x512xf32> to vector<8x512xbf16>
    %c0_15 = arith.constant 0 : index
    %c0_16 = arith.constant 0 : index
    %33 = vector.load %arg6[%c0_15, %c0_16] : memref<512x384xbf16, #tpu.memory_space<vmem>>, vector<512x384xbf16>
    %cst_17 = arith.constant dense<0.000000e+00> : vector<8x384xf32>
    %34 = tpu.matmul %32, %33, %cst_17 {dimension_numbers = #tpu.dot_dimension_numbers<[1], [0], [0], [1], [0, 0, 1, 1], [], []>} : vector<8x512xbf16>, vector<512x384xbf16>, vector<8x384xf32> -> vector<8x384xf32>
    %c0_18 = arith.constant 0 : index
    %c0_19 = arith.constant 0 : index
    %35 = vector.load %arg7[%c0_18, %c0_19] : memref<1x384xf32, #tpu.memory_space<vmem>>, vector<1x384xf32>
    %36 = vector.broadcast %35 : vector<1x384xf32> to vector<8x384xf32>
    %37 = arith.addf %34, %36 : vector<8x384xf32>
    %c0_20 = arith.constant 0 : index
    %c0_21 = arith.constant 0 : index
    %38 = vector.load %arg8[%c0_20, %c0_21] : memref<1x384xf32, #tpu.memory_space<vmem>>, vector<1x384xf32>
    %c0_22 = arith.constant 0 : index
    %c0_23 = arith.constant 0 : index
    %39 = vector.load %arg9[%c0_22, %c0_23] : memref<1x384xf32, #tpu.memory_space<vmem>>, vector<1x384xf32>
    %c0_24 = arith.constant 0 : index
    %c0_25 = arith.constant 0 : index
    %40 = vector.load %arg10[%c0_24, %c0_25] : memref<1x384xf32, #tpu.memory_space<vmem>>, vector<1x384xf32>
    %cst_26 = arith.constant dense<0.000000e+00> : vector<8xf32>
    %41 = vector.multi_reduction <add>, %37, %cst_26 [1] : vector<8x384xf32> to vector<8xf32>
    %42 = vector.shape_cast %41 : vector<8xf32> to vector<8x1xf32>
    %cst_27 = arith.constant 0.00333333341 : f32
    %43 = vector.broadcast %cst_27 : f32 to vector<8x1xf32>
    %44 = arith.mulf %42, %43 : vector<8x1xf32>
    %45 = vector.broadcast %44 : vector<8x1xf32> to vector<8x384xf32>
    %46 = arith.subf %37, %45 : vector<8x384xf32>
    %47 = arith.mulf %46, %46 : vector<8x384xf32>
    %48 = vector.broadcast %40 : vector<1x384xf32> to vector<8x384xf32>
    %49 = arith.mulf %47, %48 : vector<8x384xf32>
    %cst_28 = arith.constant dense<0.000000e+00> : vector<8xf32>
    %50 = vector.multi_reduction <add>, %49, %cst_28 [1] : vector<8x384xf32> to vector<8xf32>
    %51 = vector.shape_cast %50 : vector<8xf32> to vector<8x1xf32>
    %cst_29 = arith.constant 0.00333333341 : f32
    %52 = vector.broadcast %cst_29 : f32 to vector<8x1xf32>
    %53 = arith.mulf %51, %52 : vector<8x1xf32>
    %cst_30 = arith.constant 9.99999974E-6 : f32
    %54 = vector.broadcast %cst_30 : f32 to vector<8x1xf32>
    %55 = arith.addf %53, %54 : vector<8x1xf32>
    %56 = math.rsqrt %55 : vector<8x1xf32>
    %57 = vector.broadcast %56 : vector<8x1xf32> to vector<8x384xf32>
    %58 = arith.mulf %46, %57 : vector<8x384xf32>
    %59 = vector.broadcast %38 : vector<1x384xf32> to vector<8x384xf32>
    %60 = arith.mulf %58, %59 : vector<8x384xf32>
    %61 = vector.broadcast %39 : vector<1x384xf32> to vector<8x384xf32>
    %62 = arith.addf %60, %61 : vector<8x384xf32>
    %63 = arith.addf %62, %4 : vector<8x384xf32>
    %cst_31 = arith.constant 0.000000e+00 : f32
    %64 = vector.broadcast %cst_31 : f32 to vector<8x384xf32>
    %65 = arith.maximumf %63, %64 : vector<8x384xf32>
    %c0_32 = arith.constant 0 : index
    %c0_33 = arith.constant 0 : index
    %66 = vector.load %arg11[%c0_32, %c0_33] : memref<1x384xf32, #tpu.memory_space<vmem>>, vector<1x384xf32>
    %67 = vector.broadcast %66 : vector<1x384xf32> to vector<8x384xf32>
    %68 = arith.mulf %65, %67 : vector<8x384xf32>
    %cst_34 = arith.constant dense<0.000000e+00> : vector<8xf32>
    %69 = vector.multi_reduction <add>, %68, %cst_34 [1] : vector<8x384xf32> to vector<8xf32>
    %70 = vector.shape_cast %69 : vector<8xf32> to vector<8x1xf32>
    %c0_35 = arith.constant 0 : index
    %c0_36 = arith.constant 0 : index
    %71 = vector.load %arg12[%c0_35, %c0_36] : memref<1x1xf32, #tpu.memory_space<vmem>>, vector<1x1xf32>
    %72 = vector.broadcast %71 : vector<1x1xf32> to vector<8x1xf32>
    %73 = arith.addf %70, %72 : vector<8x1xf32>
    %c0_37 = arith.constant 0 : index
    %c0_38 = arith.constant 0 : index
    %74 = vector.load %arg13[%c0_37, %c0_38] : memref<8x1xf32, #tpu.memory_space<vmem>>, vector<8x1xf32>
    tpu.vector_store %arg13[%c0_37, %c0_38], %73 {strides = array<i32>} : memref<8x1xf32, #tpu.memory_space<vmem>>, vector<8x1xf32>,
    return
  }
  func.func @transform_0(%arg0: i32) -> (i32, i32) {
    %c0_i32 = arith.constant 0 : i32
    %c0_i32_0 = arith.constant 0 : i32
    return %arg0, %c0_i32 : i32, i32
  }
  func.func @transform_1(%arg0: i32) -> (i32, i32) {
    %c0_i32 = arith.constant 0 : i32
    %c0_i32_0 = arith.constant 0 : i32
    %c0_i32_1 = arith.constant 0 : i32
    return %c0_i32, %c0_i32_0 : i32, i32
  }
  func.func @transform_2(%arg0: i32) -> (i32, i32) {
    %c0_i32 = arith.constant 0 : i32
    %c0_i32_0 = arith.constant 0 : i32
    %c0_i32_1 = arith.constant 0 : i32
    return %c0_i32, %c0_i32_0 : i32, i32
  }
  func.func @transform_3(%arg0: i32) -> (i32, i32) {
    %c0_i32 = arith.constant 0 : i32
    %c0_i32_0 = arith.constant 0 : i32
    %c0_i32_1 = arith.constant 0 : i32
    return %c0_i32, %c0_i32_0 : i32, i32
  }
  func.func @transform_4(%arg0: i32) -> (i32, i32) {
    %c0_i32 = arith.constant 0 : i32
    %c0_i32_0 = arith.constant 0 : i32
    %c0_i32_1 = arith.constant 0 : i32
    return %c0_i32, %c0_i32_0 : i32, i32
  }
  func.func @transform_5(%arg0: i32) -> (i32, i32) {
    %c0_i32 = arith.constant 0 : i32
    %c0_i32_0 = arith.constant 0 : i32
    %c0_i32_1 = arith.constant 0 : i32
    return %c0_i32, %c0_i32_0 : i32, i32
  }
  func.func @transform_6(%arg0: i32) -> (i32, i32) {
    %c0_i32 = arith.constant 0 : i32
    %c0_i32_0 = arith.constant 0 : i32
    %c0_i32_1 = arith.constant 0 : i32
    return %c0_i32, %c0_i32_0 : i32, i32
  }
  func.func @transform_7(%arg0: i32) -> (i32, i32) {
    %c0_i32 = arith.constant 0 : i32
    %c0_i32_0 = arith.constant 0 : i32
    %c0_i32_1 = arith.constant 0 : i32
    return %c0_i32, %c0_i32_0 : i32, i32
  }
  func.func @transform_8(%arg0: i32) -> (i32, i32) {
    %c0_i32 = arith.constant 0 : i32
    %c0_i32_0 = arith.constant 0 : i32
    %c0_i32_1 = arith.constant 0 : i32
    return %c0_i32, %c0_i32_0 : i32, i32
  }
  func.func @transform_9(%arg0: i32) -> (i32, i32) {
    %c0_i32 = arith.constant 0 : i32
    %c0_i32_0 = arith.constant 0 : i32
    %c0_i32_1 = arith.constant 0 : i32
    return %c0_i32, %c0_i32_0 : i32, i32
  }
  func.func @transform_10(%arg0: i32) -> (i32, i32) {
    %c0_i32 = arith.constant 0 : i32
    %c0_i32_0 = arith.constant 0 : i32
    %c0_i32_1 = arith.constant 0 : i32
    return %c0_i32, %c0_i32_0 : i32, i32
  }
  func.func @transform_11(%arg0: i32) -> (i32, i32) {
    %c0_i32 = arith.constant 0 : i32
    %c0_i32_0 = arith.constant 0 : i32
    %c0_i32_1 = arith.constant 0 : i32
    return %c0_i32, %c0_i32_0 : i32, i32
  }
  func.func @transform_12(%arg0: i32) -> (i32, i32) {
    %c0_i32 = arith.constant 0 : i32
    %c0_i32_0 = arith.constant 0 : i32
    return %arg0, %c0_i32 : i32, i32
  }
}

</mosaic_0001>

<bundles_post_ra>
// kernel: critic_forward.1
= control target key start
LH: loop header
LB: loop body
LE: loop exit
PB: predicated region body
PF: predicated region fallthrough
CT: control target
= control target key end

     0   :  { %s2043_s0 = inlined_call_operand.vmem [shape: bf16[8,13], index: 0, kind: input, shape index: {}]   ;;  %s2044_s1 = inlined_call_operand.hbm [shape: bf16[13,896], index: 1, kind: input, shape index: {}]   ;;  %s2045_s2 = inlined_call_operand.vmem [shape: f32[1,512], index: 2, kind: input, shape index: {}]   ;;  %s2046_s3 = inlined_call_operand.vmem [shape: f32[1,512], index: 3, kind: input, shape index: {}]   ;;  %s2047_s4 = inlined_call_operand.vmem [shape: f32[1,512], index: 4, kind: input, shape index: {}]   ;;  %s2048_s5 = inlined_call_operand.hbm [shape: bf16[512,384], index: 5, kind: input, shape index: {}]   ;;  %s2049_s6 = inlined_call_operand.vmem [shape: f32[1,384], index: 6, kind: input, shape index: {}]   ;;  %s2050_s7 = inlined_call_operand.vmem [shape: f32[1,384], index: 7, kind: input, shape index: {}]   ;;  %s2051_s8 = inlined_call_operand.hbm [shape: f32[1,384], index: 8, kind: input, shape index: {}]   ;;  %s2052_s9 = inlined_call_operand.vmem [shape: f32[1,384], index: 9, kind: input, shape index: {}]   ;;  %s2053_s10 = inlined_call_operand.vmem [shape: f32[1,384], index: 10, kind: input, shape index: {}]   ;;  %s2054_s11 = inlined_call_operand.<no memory space> [shape: f32[1,1], index: 11, kind: input, shape index: {}]   ;;  %s2055_s12 = inlined_call_operand.vmem [shape: f32[8,1], index: 12, kind: output, shape index: {}]  }
   0x1   :  { %v17_v0 = vstv %s2054_s11 }
   0x2   :  { %18 = vst [vmem:[#allocation2] sm:$0x1] %v17_v0 }
   0x3   :  { %19 = vsyncpa [#allocation4], 0 }
   0x4   :  { %20 = vsyncpa [#allocation6], 0  ;;  %s46_s25 = sshll.u32 %s2048_s5, 4  ;;  %s1844_s26 = smov [#allocation5]   ;;  %s47_s25 = int_to_ptr.hbm [resolvable:$true] %s46_s25 }
   0x5   :  { %s48_s27 = sshll.u32 %s1844_s26, 4  ;;  %s27_s30 = sshll.u32 %s2044_s1, 4  ;;  %s49_s27 = int_to_ptr.vmem [resolvable:$true] %s48_s27  ;;  %s28_s30 = int_to_ptr.hbm [resolvable:$true] %s27_s30 }
   0x6   :  { %s1845_s13 = smov 192   ;;  %s1846_s14 = smov 12  }
   0x7   :  { %54 = dma.hbm_to_vmem [thread:$0]  %s47_s25, 12288, %s49_s27, [#allocation6], %s1845_s13, %s1845_s13, %s1846_s14  }
   0x8   :  { %s1847_s11 = smov [#allocation3]   ;;  %s1848_s16 = smov 448  }
   0x9   :  { %s29_s15 = sshll.u32 %s1847_s11, 4  ;;  %s1849_s17 = smov 28   ;;  %s30_s15 = int_to_ptr.vmem [resolvable:$true] %s29_s15 }
   0xa   :  { %35 = dma.hbm_to_vmem [thread:$0]  %s28_s30, 896, %s30_s15, [#allocation4], %s1848_s16, %s1848_s16, %s1849_s17  }
   0xb   :  { %s64_s19 = sshll.u32 %s2051_s8, 4  ;;  %s1850_s20 = smov [#allocation7]   ;;  %s65_s19 = int_to_ptr.hbm [resolvable:$true] %s64_s19 }
   0xc   :  { %s66_s21 = sshll.u32 %s1850_s20, 4  ;;  %s67_s21 = int_to_ptr.vmem [resolvable:$true] %s66_s21 }
   0xd   :  { %69 = dma.hbm_to_vmem [thread:$0]  %s65_s19, 48, %s67_s21, [#allocation6]  }
   0xe   :  { %1840 = dma.done.wait [#allocation4], 896  }
   0xf   :  { %1841 = vsyncadd [#allocation4], 4294966400 }
  0x10   :  { %1842 = dma.done.wait [#allocation6], 12336  }
  0x11   :  { %1843 = vsyncadd [#allocation6], 4294954960  ;;  %vm131_vm0 = vcmask 1045504   ;;  %vm132_vm1 = vcmask 1046528   ;;  %v1851_v1 = vmov 65535   ;;  %vm127_vm2 = vcmask 105472  }
  0x12   :  { %v133_v2 = vsel %vm131_vm0, 4294967295, %v1851_v1  ;;  %v1235_v4 = vld [vmem:[#allocation3] sm:$0xf]  ;;  %v1655_v5 = vld [vmem:[#allocation3 + $0x18] sm:$0x70]  ;;  %vm1225_vm9 = vcmask 7168  }
  0x13   :  { %v134_v3 = vsel %vm132_vm1, %v133_v2, 0  ;;  %v1652_v6 = vld [vmem:[#allocation3 + $0x4] sm:$0xf]  ;;  %v1236_v7 = vor.u32 %v1655_v5, %v1235_v4  ;;  %v1237_v8 = vld [vmem:[#allocation3 + $0x1c] sm:$0x70] }
  0x14   :  { %v1243_v9 = vld [vmem:[#allocation3 + $0x8] sm:$0xf]  ;;  %v1656_v10 = vld [vmem:[#allocation3 + $0x20] sm:$0x70]  ;;  %v1240_v11 = vor.u32 %v1652_v6, %v1237_v8  ;;  %v1653_v13 = vld [vmem:[#allocation3 + $0xc] sm:$0xf] }
  0x15   :  { %v1244_v12 = vor.u32 %v1656_v10, %v1243_v9  ;;  %v1245_v14 = vld [vmem:[#allocation3 + $0x24] sm:$0x70]  ;;  %v136_v15 = vand.u32 %v1236_v7, %v134_v3  ;;  %v1932_v20 = vld [vmem:[%s2043_s0] sm:$0xf]  ;;  %v1251_v32 = vld [vmem:[#allocation3 + $0x10] sm:$0xf] }
  0x16   :  { %v1248_v16 = vor.u32 %v1653_v13, %v1245_v14  ;;  %v139_v17 = vand.u32 %v1240_v11, %v134_v3  ;;  %v1657_v33 = vld [vmem:[#allocation3 + $0x28] sm:$0x70]  ;;  %v1654_v34 = vld [vmem:[#allocation3 + $0x14] sm:$0xf]  ;;  %v1253_v36 = vld [vmem:[#allocation3 + $0x2c] sm:$0x70] }
  0x17   :  { %v142_v18 = vand.u32 %v1244_v12, %v134_v3  ;;  %163 = vmatpush.bf16.msra.mxu0 %v136_v15  ;;  %v1252_v35 = vor.u32 %v1657_v33, %v1251_v32  ;;  %v1259_v37 = vld [vmem:[#allocation3 + $0x18] sm:$0xf]  ;;  %v1658_v38 = vld [vmem:[#allocation3 + $0x30] sm:$0x70]  ;;  %v1256_v39 = vor.u32 %v1654_v34, %v1253_v36  ;;  %v1354_v41 = vld [vmem:[#allocation5 + $0xa8] sm:$0xf] }
  0x18   :  { %v145_v19 = vand.u32 %v1248_v16, %v134_v3  ;;  %176 = vmatpush.bf16.msra.mxu1 %v139_v17  ;;  %v1260_v40 = vor.u32 %v1658_v38, %v1259_v37  ;;  %v1681_v42 = vld [vmem:[#allocation5 + $0xb0] sm:$0xf0]  ;;  %v1450_v43 = vld [vmem:[#allocation5 + $0x168] sm:$0xf]  ;;  %v1342_v55 = vld [vmem:[#allocation5 + $0x90] sm:$0xf] }
  0x19   :  { %189 = vmatpush.bf16.msra.mxu2 %v142_v18  ;;  %v148_v44 = vand.u32 %v1252_v35, %v134_v3  ;;  %v1355_v45 = vor.u32 %v1681_v42, %v1354_v41  ;;  %v1705_v46 = vld [vmem:[#allocation5 + $0x170] sm:$0xf0]  ;;  %v1546_v47 = vld [vmem:[#allocation5 + $0x228] sm:$0xf]  ;;  %v151_v49 = vand.u32 %v1256_v39, %v134_v3  ;;  %v1678_v57 = vld [vmem:[#allocation5 + $0x98] sm:$0xf0] }
  0x1a   :  { %202 = vmatpush.bf16.msra.mxu3 %v145_v19  ;;  %1261 = vmatmul.msk.bf16.vlgmr.msra.gmra.mxu0 %vm127_vm2, %v1932_v20  ;;  %v1729_v48 = vld [vmem:[#allocation5 + $0x230] sm:$0xf0]  ;;  %v154_v50 = vand.u32 %v1260_v40, %v134_v3  ;;  %v1451_v51 = vor.u32 %v1705_v46, %v1450_v43  ;;  %v1642_v53 = vld [vmem:[#allocation5 + $0x2e8] sm:$0xf]  ;;  %v1438_v58 = vld [vmem:[#allocation5 + $0x150] sm:$0xf]  ;;  %v1343_v60 = vor.u32 %v1678_v57, %v1342_v55 }
  0x1b   :  { %1262 = vmatmul.msk.bf16.vlgmr.msra.gmra.mxu1 %vm127_vm2, %v1932_v20  ;;  %v1547_v52 = vor.u32 %v1729_v48, %v1546_v47  ;;  %v1753_v54 = vld [vmem:[#allocation5 + $0x2f0] sm:$0xf0]  ;;  %215 = vmatpush.bf16.msrb.mxu0 %v148_v44  ;;  %v1702_v59 = vld [vmem:[#allocation5 + $0x158] sm:$0xf0]  ;;  %v1534_v61 = vld [vmem:[#allocation5 + $0x210] sm:$0xf] }
  0x1c   :  { %1263 = vmatmul.msk.bf16.vlgmr.msra.gmra.mxu2 %vm127_vm2, %v1932_v20  ;;  %v1643_v56 = vor.u32 %v1753_v54, %v1642_v53  ;;  %228 = vmatpush.bf16.msrb.mxu1 %v151_v49  ;;  %v1726_v62 = vld [vmem:[#allocation5 + $0x218] sm:$0xf0]  ;;  %v1630_v63 = vld [vmem:[#allocation5 + $0x2d0] sm:$0xf]  ;;  %v1439_v0 = vor.u32 %v1702_v59, %v1438_v58  ;;  %v1330_v3 = vld [vmem:[#allocation5 + $0x78] sm:$0xf] }
  0x1d   :  { %1264 = vmatmul.msk.bf16.vlgmr.msra.gmra.mxu3 %vm127_vm2, %v1932_v20  ;;  %241 = vmatpush.bf16.msrb.mxu2 %v154_v50  ;;  %v1535_v1 = vor.u32 %v1726_v62, %v1534_v61  ;;  %v1750_v2 = vld [vmem:[#allocation5 + $0x2d8] sm:$0xf0]  ;;  %v1675_v4 = vld [vmem:[#allocation5 + $0x80] sm:$0xf0]  ;;  %v1426_v6 = vld [vmem:[#allocation5 + $0x138] sm:$0xf] }
  0x1e   :  { %980 = vmatpush.bf16.msrb.mxu3 %v1355_v45  ;;  %v1631_v5 = vor.u32 %v1750_v2, %v1630_v63  ;;  %v1699_v7 = vld [vmem:[#allocation5 + $0x140] sm:$0xf0]  ;;  %v1522_v8 = vld [vmem:[#allocation5 + $0x1f8] sm:$0xf]  ;;  %v1331_v9 = vor.u32 %v1675_v4, %v1330_v3  ;;  %v1318_v13 = vld [vmem:[#allocation5 + $0x60] sm:$0xf] }
  0x1f   :  { %993 = vmatpush.bf16.msra.mxu0 %v1451_v51  ;;  %v1723_v10 = vld [vmem:[#allocation5 + $0x200] sm:$0xf0]  ;;  %v1618_v11 = vld [vmem:[#allocation5 + $0x2b8] sm:$0xf]  ;;  %v1672_v14 = vld [vmem:[#allocation5 + $0x68] sm:$0xf0]  ;;  %v1427_v15 = vor.u32 %v1699_v7, %v1426_v6 }
  0x20   :  { %1006 = vmatpush.bf16.msra.mxu1 %v1547_v52  ;;  %v1747_v12 = vld [vmem:[#allocation5 + $0x2c0] sm:$0xf0]  ;;  %v1523_v16 = vor.u32 %v1723_v10, %v1522_v8  ;;  %v1414_v17 = vld [vmem:[#allocation5 + $0x120] sm:$0xf]  ;;  %v1696_v19 = vld [vmem:[#allocation5 + $0x128] sm:$0xf0] }
  0x21   :  { %1019 = vmatpush.bf16.msra.mxu2 %v1643_v56  ;;  %v1619_v18 = vor.u32 %v1747_v12, %v1618_v11  ;;  %v1415_v32 = vor.u32 %v1696_v19, %v1414_v17  ;;  %v1402_v34 = vld [vmem:[#allocation5 + $0x108] sm:$0xf]  ;;  %v1693_v35 = vld [vmem:[#allocation5 + $0x110] sm:$0xf0]  ;;  %v1294_v45 = vld [vmem:[#allocation5 + $0x30] sm:$0xf] }
  0x22   :  { %981 = vmatpush.bf16.msrb.mxu3 %v1343_v60  ;;  %v1498_v36 = vld [vmem:[#allocation5 + $0x1c8] sm:$0xf]  ;;  %v1717_v38 = vld [vmem:[#allocation5 + $0x1d0] sm:$0xf0]  ;;  %v1666_v46 = vld [vmem:[#allocation5 + $0x38] sm:$0xf0]  ;;  %v1403_v48 = vor.u32 %v1693_v35, %v1402_v34 }
  0x23   :  { %994 = vmatpush.bf16.msra.mxu0 %v1439_v0  ;;  %v1594_v39 = vld [vmem:[#allocation5 + $0x288] sm:$0xf]  ;;  %v1741_v40 = vld [vmem:[#allocation5 + $0x290] sm:$0xf0]  ;;  %v1499_v49 = vor.u32 %v1717_v38, %v1498_v36  ;;  %v1390_v51 = vld [vmem:[#allocation5 + $0xf0] sm:$0xf]  ;;  %v1295_v59 = vor.u32 %v1666_v46, %v1294_v45 }
  0x24   :  { %1007 = vmatpush.bf16.msra.mxu1 %v1535_v1  ;;  %v1595_v50 = vor.u32 %v1741_v40, %v1594_v39  ;;  %v1690_v56 = vld [vmem:[#allocation5 + $0xf8] sm:$0xf0]  ;;  %v1486_v57 = vld [vmem:[#allocation5 + $0x1b0] sm:$0xf]  ;;  %v1282_v62 = vld [vmem:[#allocation5 + $0x18] sm:$0xf] }
  0x25   :  { %1020 = vmatpush.bf16.msra.mxu2 %v1631_v5  ;;  %v1714_v58 = vld [vmem:[#allocation5 + $0x1b8] sm:$0xf0]  ;;  %v1582_v60 = vld [vmem:[#allocation5 + $0x270] sm:$0xf]  ;;  %v1663_v63 = vld [vmem:[#allocation5 + $0x20] sm:$0xf0]  ;;  %v1391_v1 = vor.u32 %v1690_v56, %v1390_v51 }
  0x26   :  { %982 = vmatpush.bf16.msrb.mxu3 %v1331_v9  ;;  %v1738_v61 = vld [vmem:[#allocation5 + $0x278] sm:$0xf0]  ;;  %v1487_v2 = vor.u32 %v1714_v58, %v1486_v57  ;;  %v1378_v3 = vld [vmem:[#allocation5 + $0xd8] sm:$0xf]  ;;  %v1687_v8 = vld [vmem:[#allocation5 + $0xe0] sm:$0xf0]  ;;  %v1283_v11 = vor.u32 %v1663_v63, %v1282_v62 }
  0x27   :  { %995 = vmatpush.bf16.msra.mxu0 %v1427_v15  ;;  %v1583_v7 = vor.u32 %v1738_v61, %v1582_v60  ;;  %v1474_v9 = vld [vmem:[#allocation5 + $0x198] sm:$0xf]  ;;  %v1711_v10 = vld [vmem:[#allocation5 + $0x1a0] sm:$0xf0]  ;;  %v1558_v35 = vld [vmem:[#allocation5 + $0x240] sm:$0xf] }
  0x28   :  { %1008 = vmatpush.bf16.msra.mxu1 %v1523_v16  ;;  %v1570_v12 = vld [vmem:[#allocation5 + $0x258] sm:$0xf]  ;;  %v1379_v16 = vor.u32 %v1687_v8, %v1378_v3  ;;  %v1475_v17 = vor.u32 %v1711_v10, %v1474_v9  ;;  %v1732_v36 = vld [vmem:[#allocation5 + $0x248] sm:$0xf0]  ;;  %v1701_v57 = vld [vmem:[#allocation5 + $0x154] sm:$0xf] }
  0x29   :  { %1021 = vmatpush.bf16.msra.mxu2 %v1619_v18  ;;  %v1559_v38 = vor.u32 %v1732_v36, %v1558_v35  ;;  %v1356_v39 = vld [vmem:[#allocation5 + $0xb4] sm:$0xf0]  ;;  %v1704_v40 = vld [vmem:[#allocation5 + $0x16c] sm:$0xf]  ;;  %v1440_v58 = vld [vmem:[#allocation5 + $0x15c] sm:$0xf0] }
  0x2a   :  { %1265 = vmatmul.msk.bf16.vlgmr.msrb.gmra.mxu0 %vm127_vm2, %v1932_v20  ;;  %v1548_v45 = vld [vmem:[#allocation5 + $0x234] sm:$0xf0]  ;;  %v1752_v46 = vld [vmem:[#allocation5 + $0x2ec] sm:$0xf]  ;;  %v1443_v60 = vor.u32 %v1701_v57, %v1440_v58  ;;  %v1536_v61 = vld [vmem:[#allocation5 + $0x21c] sm:$0xf0] }
  0x2b   :  { %1266 = vmatmul.msk.bf16.vlgmr.msrb.gmra.mxu1 %vm127_vm2, %v1932_v20  ;;  %996 = vmatpush.bf16.msra.mxu0 %v1415_v32  ;;  %v1708_v32 = vld [vmem:[#allocation5 + $0x188] sm:$0xf0]  ;;  %v1674_v62 = vld [vmem:[#allocation5 + $0x7c] sm:$0xf]  ;;  %v1332_v63 = vld [vmem:[#allocation5 + $0x84] sm:$0xf0] }
  0x2c   :  { %1267 = vmatmul.msk.bf16.vlgmr.msrb.gmra.mxu2 %vm127_vm2, %v1932_v20  ;;  %v1306_v20 = vld [vmem:[#allocation5 + $0x48] sm:$0xf]  ;;  %v1722_v3 = vld [vmem:[#allocation5 + $0x1fc] sm:$0xf]  ;;  %v1671_v10 = vld [vmem:[#allocation5 + $0x64] sm:$0xf] }
  0x2d   :  { %v1620_v8 = vld [vmem:[#allocation5 + $0x2c4] sm:$0xf0]  ;;  %v1740_v35 = vld [vmem:[#allocation5 + $0x28c] sm:$0xf]  ;;  %v1596_v36 = vld [vmem:[#allocation5 + $0x294] sm:$0xf0] }
  0x2e   :  { %v1380_v57 = vld [vmem:[#allocation5 + $0xe4] sm:$0xf0]  ;;  %v1710_v58 = vld [vmem:[#allocation5 + $0x19c] sm:$0xf] }
  0x2f   :  { %997 = vmatpush.bf16.msra.mxu0 %v1403_v48  ;;  %v1644_v48 = vld [vmem:[#allocation5 + $0x2f4] sm:$0xf0] }
  0x30   :  { %v1647_v51 = vor.u32 %v1752_v46, %v1644_v48  ;;  %v1584_v48 = vld [vmem:[#allocation5 + $0x27c] sm:$0xf0] }
  0x33   :  { %998 = vmatpush.bf16.msra.mxu0 %v1391_v1  ;;  %v1335_v1 = vor.u32 %v1674_v62, %v1332_v63  ;;  %v1659_v62 = vld [vmem:[#allocation5 + $0x4] sm:$0xf]  ;;  %v1272_v63 = vld [vmem:[#allocation5 + $0xc] sm:$0xf0] }
  0x37   :  { %999 = vmatpush.bf16.msra.mxu0 %v1379_v16  ;;  %v1512_v16 = vld [vmem:[#allocation5 + $0x1ec] sm:$0xf0] }
  0x97   :  { %v1942_v21 = vpop.f32.mrf.mxu0 }
  0x98   :  { %v1944_v22 = vpop.f32.mrf.mxu1 }
  0x99   :  { %v250_v23 = vadd.f32 %v1944_v22, %v1942_v21 }
  0x9f   :  { %v1948_v24 = vpop.f32.mrf.mxu2  ;;  %v167_v27 = vpop.f32.mrf.mxu0 }
  0xa0   :  { %v251_v25 = vadd.f32 %v250_v23, %v1948_v24  ;;  %v1951_v26 = vpop.f32.mrf.mxu3  ;;  %v180_v28 = vpop.f32.mrf.mxu1  ;;  %v1510_v23 = vld [vmem:[#allocation5 + $0x1e0] sm:$0xf]  ;;  %v1319_v27 = vor.u32 %v1672_v14, %v1318_v13  ;;  %v1735_v13 = vld [vmem:[#allocation5 + $0x260] sm:$0xf0] }
  0xa1   :  { %v1606_v28 = vld [vmem:[#allocation5 + $0x2a0] sm:$0xf] }
  0xa2   :  { %v252_v29 = vadd.f32 %v251_v25, %v1951_v26  ;;  %v1720_v25 = vld [vmem:[#allocation5 + $0x1e8] sm:$0xf0]  ;;  %983 = vmatpush.bf16.msrb.mxu3 %v1319_v27  ;;  %v1270_v27 = vld [vmem:[#allocation5] sm:$0xf] }
  0xa3   :  { %v1511_v33 = vor.u32 %v1720_v25, %v1510_v23  ;;  %v1571_v23 = vor.u32 %v1735_v13, %v1570_v12  ;;  %v1695_v12 = vld [vmem:[#allocation5 + $0x124] sm:$0xf] }
  0xa4   :  { %253 = vadd.xlane.f32.xlu0 %v252_v29  ;;  %v1744_v29 = vld [vmem:[#allocation5 + $0x2a8] sm:$0xf0] }
  0xa5   :  { %v1607_v37 = vor.u32 %v1744_v29, %v1606_v28  ;;  %1009 = vmatpush.bf16.msra.mxu1 %v1511_v33  ;;  %v1660_v28 = vld [vmem:[#allocation5 + $0x8] sm:$0xf0]  ;;  %v1366_v29 = vld [vmem:[#allocation5 + $0xc0] sm:$0xf] }
  0xa7   :  { %v193_v30 = vpop.f32.mrf.mxu2  ;;  %1022 = vmatpush.bf16.msra.mxu2 %v1607_v37  ;;  %v1680_v37 = vld [vmem:[#allocation5 + $0xac] sm:$0xf] }
  0xa8   :  { %v206_v31 = vpop.f32.mrf.mxu3  ;;  %v1963_v30 = vld [vmem:[%s2047_s4] sm:$0xf] }
  0xa9   :  { %v1669_v31 = vld [vmem:[#allocation5 + $0x50] sm:$0xf0]  ;;  %v265_v42 = vperm.slane %v1963_v30, 0  ;;  %v266_v47 = vperm.slane %v1963_v30, 1  ;;  %v268_v0 = vperm.slane %v1963_v30, 3  ;;  %1010 = vmatpush.bf16.msra.mxu1 %v1499_v49 }
  0xaa   :  { %v1307_v43 = vor.u32 %v1669_v31, %v1306_v20  ;;  %v1684_v20 = vld [vmem:[#allocation5 + $0xc8] sm:$0xf0]  ;;  %v1462_v31 = vld [vmem:[#allocation5 + $0x180] sm:$0xf]  ;;  %v1677_v49 = vld [vmem:[#allocation5 + $0x94] sm:$0xf] }
  0xab   :  { %1023 = vmatpush.bf16.msra.mxu2 %v1595_v50  ;;  %v1367_v33 = vor.u32 %v1684_v20, %v1366_v29  ;;  %v1463_v34 = vor.u32 %v1708_v32, %v1462_v31  ;;  %v1344_v50 = vld [vmem:[#allocation5 + $0x9c] sm:$0xf0]  ;;  %v1692_v29 = vld [vmem:[#allocation5 + $0x10c] sm:$0xf]  ;;  %v1404_v20 = vld [vmem:[#allocation5 + $0x114] sm:$0xf0] }
  0xac   :  { %984 = vmatpush.bf16.msrb.mxu3 %v1307_v43  ;;  %v1347_v56 = vor.u32 %v1677_v49, %v1344_v50  ;;  %v1716_v31 = vld [vmem:[#allocation5 + $0x1cc] sm:$0xf]  ;;  %v1500_v32 = vld [vmem:[#allocation5 + $0x1d4] sm:$0xf0]  ;;  %v1662_v49 = vld [vmem:[#allocation5 + $0x1c] sm:$0xf] }
  0xad   :  { %1011 = vmatpush.bf16.msra.mxu1 %v1487_v2  ;;  %1000 = vmatpush.bf16.msra.mxu0 %v1367_v33  ;;  %v1428_v2 = vld [vmem:[#allocation5 + $0x144] sm:$0xf0]  ;;  %v1407_v33 = vor.u32 %v1692_v29, %v1404_v20 }
  0xaf   :  { %1024 = vmatpush.bf16.msra.mxu2 %v1583_v7  ;;  %v1746_v7 = vld [vmem:[#allocation5 + $0x2bc] sm:$0xf] }
  0xb0   :  { %985 = vmatpush.bf16.msrb.mxu3 %v1295_v59  ;;  %v1725_v59 = vld [vmem:[#allocation5 + $0x214] sm:$0xf]  ;;  %v1623_v9 = vor.u32 %v1746_v7, %v1620_v8  ;;  %v1464_v7 = vld [vmem:[#allocation5 + $0x18c] sm:$0xf0]  ;;  %v1731_v8 = vld [vmem:[#allocation5 + $0x244] sm:$0xf] }
  0xb1   :  { %1012 = vmatpush.bf16.msra.mxu1 %v1475_v17 }
  0xb3   :  { %1025 = vmatpush.bf16.msra.mxu2 %v1571_v23  ;;  %v1608_v23 = vld [vmem:[#allocation5 + $0x2ac] sm:$0xf0] }
  0xb4   :  { %986 = vmatpush.bf16.msrb.mxu3 %v1283_v11  ;;  %v1320_v11 = vld [vmem:[#allocation5 + $0x6c] sm:$0xf0] }
  0xb5   :  { %1013 = vmatpush.bf16.msra.mxu1 %v1463_v34  ;;  %v1323_v13 = vor.u32 %v1671_v10, %v1320_v11  ;;  %v1503_v34 = vor.u32 %v1716_v31, %v1500_v32  ;;  %v1560_v10 = vld [vmem:[#allocation5 + $0x24c] sm:$0xf0] }
  0xb7   :  { %1026 = vmatpush.bf16.msra.mxu2 %v1559_v38  ;;  %v1665_v38 = vld [vmem:[#allocation5 + $0x34] sm:$0xf] }
  0xbb   :  { %1071 = vmatpush.bf16.msrb.mxu2 %v1647_v51  ;;  %v1284_v51 = vld [vmem:[#allocation5 + $0x24] sm:$0xf0] }
 0x117   :  { %v254_v41 = vpop.xlane.xlu0 %253 }
 0x118   :  { %v255_v44 = vmul.f32 0.0025, %v254_v41  ;;  %v1452_v41 = vld [vmem:[#allocation5 + $0x174] sm:$0xf0] }
 0x119   :  { %v1455_v43 = vor.u32 %v1704_v40, %v1452_v41  ;;  %v1689_v40 = vld [vmem:[#allocation5 + $0xf4] sm:$0xf] }
 0x11a   :  { %v1968_v52 = vsub.f32 %v1942_v21, %v255_v44  ;;  %v1971_v53 = vsub.f32 %v1944_v22, %v255_v44  ;;  %v1974_v54 = vsub.f32 %v1948_v24, %v255_v44  ;;  %v1977_v55 = vsub.f32 %v1951_v26, %v255_v44  ;;  %v1728_v44 = vld [vmem:[#allocation5 + $0x22c] sm:$0xf] }
 0x11b   :  { %v267_v26 = vperm.slane %v1963_v30, 2  ;;  %v1271_v30 = vor.u32 %v1660_v28, %v1270_v27  ;;  %1045 = vmatpush.bf16.msrb.mxu0 %v1455_v43  ;;  %v1668_v27 = vld [vmem:[#allocation5 + $0x4c] sm:$0xf]  ;;  %v1308_v28 = vld [vmem:[#allocation5 + $0x54] sm:$0xf0] }
 0x11c   :  { %v260_v21 = vmul.f32 %v1968_v52, %v1968_v52  ;;  %v261_v22 = vmul.f32 %v1971_v53, %v1971_v53  ;;  %v262_v24 = vmul.f32 %v1974_v54, %v1974_v54  ;;  %v263_v4 = vmul.f32 %v1977_v55, %v1977_v55  ;;  %v1713_v43 = vld [vmem:[#allocation5 + $0x1b4] sm:$0xf] }
 0x11d   :  { %987 = vmatpush.bf16.msrb.mxu3 %v1271_v30  ;;  %v1311_v30 = vor.u32 %v1668_v27, %v1308_v28 }
 0x11e   :  { %v273_v5 = vmul.f32 %v265_v42, %v260_v21  ;;  %v274_v6 = vmul.f32 %v266_v47, %v261_v22  ;;  %v275_v14 = vmul.f32 %v267_v26, %v262_v24  ;;  %v276_v18 = vmul.f32 %v268_v0, %v263_v4  ;;  %v1749_v21 = vld [vmem:[#allocation5 + $0x2d4] sm:$0xf]  ;;  %v1632_v22 = vld [vmem:[#allocation5 + $0x2dc] sm:$0xf0]  ;;  %v1698_v0 = vld [vmem:[#allocation5 + $0x13c] sm:$0xf] }
 0x11f   :  { %v1359_v42 = vor.u32 %v1680_v37, %v1356_v39  ;;  %v1551_v47 = vor.u32 %v1728_v44, %v1548_v45  ;;  %v1539_v24 = vor.u32 %v1725_v59, %v1536_v61  ;;  %v1635_v26 = vor.u32 %v1749_v21, %v1632_v22  ;;  %1046 = vmatpush.bf16.msrb.mxu0 %v1443_v60  ;;  %v1524_v4 = vld [vmem:[#allocation5 + $0x204] sm:$0xf0]  ;;  %v1296_v39 = vld [vmem:[#allocation5 + $0x3c] sm:$0xf0]  ;;  %v1734_v60 = vld [vmem:[#allocation5 + $0x25c] sm:$0xf] }
 0x120   :  { %v277_v15 = vadd.f32 %v274_v6, %v273_v5  ;;  %v1431_v5 = vor.u32 %v1698_v0, %v1428_v2  ;;  %v1527_v6 = vor.u32 %v1722_v3, %v1524_v4  ;;  %v1599_v37 = vor.u32 %v1740_v35, %v1596_v36  ;;  %v1488_v44 = vld [vmem:[#allocation5 + $0x1bc] sm:$0xf0]  ;;  %v1476_v59 = vld [vmem:[#allocation5 + $0x1a4] sm:$0xf0]  ;;  %v1683_v2 = vld [vmem:[#allocation5 + $0xc4] sm:$0xf] }
 0x121   :  { %1032 = vmatpush.bf16.msra.mxu3 %v1359_v42  ;;  %1058 = vmatpush.bf16.msrb.mxu1 %v1551_v47  ;;  %v1299_v41 = vor.u32 %v1665_v38, %v1296_v39  ;;  %v1392_v42 = vld [vmem:[#allocation5 + $0xfc] sm:$0xf0]  ;;  %v1491_v46 = vor.u32 %v1713_v43, %v1488_v44  ;;  %v1737_v47 = vld [vmem:[#allocation5 + $0x274] sm:$0xf]  ;;  %v1287_v61 = vor.u32 %v1662_v49, %v1284_v51  ;;  %v1572_v22 = vld [vmem:[#allocation5 + $0x264] sm:$0xf0] }
 0x122   :  { %v278_v19 = vadd.f32 %v277_v15, %v275_v14  ;;  %1072 = vmatpush.bf16.msrb.mxu2 %v1635_v26  ;;  %v1416_v14 = vld [vmem:[#allocation5 + $0x12c] sm:$0xf0]  ;;  %v1719_v15 = vld [vmem:[#allocation5 + $0x1e4] sm:$0xf]  ;;  %v1395_v45 = vor.u32 %v1689_v40, %v1392_v42  ;;  %v1587_v50 = vor.u32 %v1737_v47, %v1584_v48  ;;  %v1575_v26 = vor.u32 %v1734_v60, %v1572_v22  ;;  %v1682_v47 = vld [vmem:[#allocation5 + $0xb8] sm:$0xf0] }
 0x123   :  { %1047 = vmatpush.bf16.msrb.mxu0 %v1431_v5  ;;  %v1419_v17 = vor.u32 %v1695_v12, %v1416_v14  ;;  %v1368_v3 = vld [vmem:[#allocation5 + $0xcc] sm:$0xf0]  ;;  %v1707_v4 = vld [vmem:[#allocation5 + $0x184] sm:$0xf]  ;;  %v1563_v12 = vor.u32 %v1731_v8, %v1560_v10  ;;  %v1706_v49 = vld [vmem:[#allocation5 + $0x178] sm:$0xf0]  ;;  %v2011_v10 = vpop.f32.mrf.mxu0 }
 0x124   :  { %v279_v25 = vadd.f32 %v278_v19, %v276_v18  ;;  %v1515_v18 = vor.u32 %v1719_v15, %v1512_v16  ;;  %v1743_v19 = vld [vmem:[#allocation5 + $0x2a4] sm:$0xf]  ;;  %v1362_v42 = vld [vmem:[#allocation5 + $0xb0] sm:$0xf]  ;;  %v1338_v8 = vld [vmem:[#allocation5 + $0x80] sm:$0xf] }
 0x125   :  { %1033 = vmatpush.bf16.msra.mxu3 %v1347_v56  ;;  %1059 = vmatpush.bf16.msrb.mxu1 %v1539_v24  ;;  %v1686_v56 = vld [vmem:[#allocation5 + $0xdc] sm:$0xf]  ;;  %v1479_v24 = vor.u32 %v1710_v58, %v1476_v59  ;;  %v1458_v48 = vld [vmem:[#allocation5 + $0x170] sm:$0xf]  ;;  %v1363_v58 = vor.u32 %v1682_v47, %v1362_v42 }
 0x126   :  { %280 = vadd.xlane.f32.xlu0 %v279_v25  ;;  %1073 = vmatpush.bf16.msrb.mxu2 %v1623_v9  ;;  %v1611_v25 = vor.u32 %v1743_v19, %v1608_v23  ;;  %v1383_v21 = vor.u32 %v1686_v56, %v1380_v57  ;;  %v1467_v9 = vor.u32 %v1707_v4, %v1464_v7  ;;  %v248_v19 = vld [vmem:[%s2046_s3] sm:$0xf]  ;;  %v1650_v51 = vld [vmem:[#allocation5 + $0x2f0] sm:$0xf]  ;;  %v1638_v4 = vld [vmem:[#allocation5 + $0x2d8] sm:$0xf] }
 0x127   :  { %1048 = vmatpush.bf16.msrb.mxu0 %v1419_v17  ;;  %v247_v17 = vld [vmem:[%s2045_s2] sm:$0xf]  ;;  %v312_v27 = vperm.slane %v248_v19, 0  ;;  %v313_v31 = vperm.slane %v248_v19, 1  ;;  %v314_v32 = vperm.slane %v248_v19, 2  ;;  %v1459_v59 = vor.u32 %v1706_v49, %v1458_v48 }
 0x128   :  { %v300_v28 = vperm.slane %v247_v17, 1  ;;  %v301_v29 = vperm.slane %v247_v17, 2  ;;  %v1506_v47 = vld [vmem:[#allocation5 + $0x1d0] sm:$0xf]  ;;  %v1718_v49 = vld [vmem:[#allocation5 + $0x1d8] sm:$0xf0] }
 0x129   :  { %1034 = vmatpush.bf16.msra.mxu3 %v1335_v1  ;;  %1060 = vmatpush.bf16.msrb.mxu1 %v1527_v6  ;;  %v1275_v1 = vor.u32 %v1659_v62, %v1272_v63  ;;  %v1371_v6 = vor.u32 %v1683_v2, %v1368_v3  ;;  %v1542_v2 = vld [vmem:[#allocation5 + $0x218] sm:$0xf]  ;;  %v1727_v3 = vld [vmem:[#allocation5 + $0x220] sm:$0xf0] }
 0x12a   :  { %1074 = vmatpush.bf16.msrb.mxu2 %v1611_v25  ;;  %v299_v25 = vperm.slane %v247_v17, 0 }
 0x12b   :  { %1049 = vmatpush.bf16.msrb.mxu0 %v1407_v33  ;;  %v315_v33 = vperm.slane %v248_v19, 3  ;;  %v1626_v19 = vld [vmem:[#allocation5 + $0x2c0] sm:$0xf] }
 0x12d   :  { %1035 = vmatpush.bf16.msra.mxu3 %v1323_v13  ;;  %1061 = vmatpush.bf16.msrb.mxu1 %v1515_v18 }
 0x12e   :  { %1075 = vmatpush.bf16.msrb.mxu2 %v1599_v37 }
 0x12f   :  { %1050 = vmatpush.bf16.msrb.mxu0 %v1395_v45 }
 0x131   :  { %1036 = vmatpush.bf16.msra.mxu3 %v1311_v30  ;;  %1062 = vmatpush.bf16.msrb.mxu1 %v1503_v34  ;;  %v302_v30 = vperm.slane %v247_v17, 3  ;;  %v2015_v17 = vpop.f32.mrf.mxu2 }
 0x132   :  { %1076 = vmatpush.bf16.msrb.mxu2 %v1587_v50  ;;  %v1554_v50 = vld [vmem:[#allocation5 + $0x230] sm:$0xf] }
 0x133   :  { %1051 = vmatpush.bf16.msrb.mxu0 %v1383_v21 }
 0x135   :  { %1037 = vmatpush.bf16.msra.mxu3 %v1299_v41  ;;  %1063 = vmatpush.bf16.msrb.mxu1 %v1491_v46 }
 0x136   :  { %1077 = vmatpush.bf16.msrb.mxu2 %v1575_v26  ;;  %v1679_v26 = vld [vmem:[#allocation5 + $0xa0] sm:$0xf0] }
 0x137   :  { %1052 = vmatpush.bf16.msrb.mxu0 %v1371_v6 }
 0x139   :  { %1038 = vmatpush.bf16.msra.mxu3 %v1287_v61  ;;  %1064 = vmatpush.bf16.msrb.mxu1 %v1479_v24  ;;  %v1350_v24 = vld [vmem:[#allocation5 + $0x98] sm:$0xf]  ;;  %v245_v48 = vpop.f32.mrf.mxu2 }
 0x13a   :  { %1078 = vmatpush.bf16.msrb.mxu2 %v1563_v12  ;;  %v1351_v6 = vor.u32 %v1679_v26, %v1350_v24  ;;  %v1543_v12 = vor.u32 %v1727_v3, %v1542_v2  ;;  %v1494_v24 = vld [vmem:[#allocation5 + $0x1b8] sm:$0xf]  ;;  %v1715_v26 = vld [vmem:[#allocation5 + $0x1c0] sm:$0xf0]  ;;  %v1290_v2 = vld [vmem:[#allocation5 + $0x20] sm:$0xf] }
 0x13b   :  { %v1664_v3 = vld [vmem:[#allocation5 + $0x28] sm:$0xf0] }
 0x13d   :  { %1039 = vmatpush.bf16.msra.mxu3 %v1275_v1  ;;  %1065 = vmatpush.bf16.msrb.mxu1 %v1467_v9  ;;  %v1703_v1 = vld [vmem:[#allocation5 + $0x160] sm:$0xf0]  ;;  %v1676_v9 = vld [vmem:[#allocation5 + $0x88] sm:$0xf0] }
 0x199   :  { %v281_v0 = vpop.xlane.xlu0 %280 }
 0x19a   :  { %v282_v5 = vmul.f32 0.0025, %v281_v0  ;;  %v1446_v0 = vld [vmem:[#allocation5 + $0x158] sm:$0xf] }
 0x19b   :  { %v1447_v7 = vor.u32 %v1703_v1, %v1446_v0 }
 0x19c   :  { %v283_v11 = vadd.f32 1e-05, %v282_v5  ;;  %v1751_v5 = vld [vmem:[#allocation5 + $0x2e0] sm:$0xf0] }
 0x19e   :  { %1764 = vrsqrt.f32 %v283_v11  ;;  %vm290_vm4 = vweird.f32 %v283_v11 }
 0x1a4   :  { %v1765_v13 = vpop.eup %1764 }
 0x1a5   :  { %v285_v14 = vmul.f32 %v1765_v13, %v283_v11  ;;  %vm291_vm3 = vweird.f32 %v1765_v13  ;;  %v2013_v11 = vpop.f32.mrf.mxu1 }
 0x1a6   :  { %vm292_vm5 = vmor %vm290_vm4, %vm291_vm3 }
 0x1a7   :  { %v286_v15 = vmul.f32 %v1765_v13, %v285_v14  ;;  %v1434_v14 = vld [vmem:[#allocation5 + $0x140] sm:$0xf] }
 0x1a9   :  { %v287_v16 = vmul.f32 0.5, %v286_v15  ;;  %v1700_v15 = vld [vmem:[#allocation5 + $0x148] sm:$0xf0] }
 0x1ab   :  { %v288_v18 = vsub.f32 1.5, %v287_v16  ;;  %v1530_v16 = vld [vmem:[#allocation5 + $0x200] sm:$0xf] }
 0x1ad   :  { %v289_v23 = vmul.f32 %v1765_v13, %v288_v18  ;;  %v1724_v18 = vld [vmem:[#allocation5 + $0x208] sm:$0xf0]  ;;  %v232_v42 = vpop.f32.mrf.mxu1 }
 0x1af   :  { %v293_v20 = vsel %vm292_vm5, %v1765_v13, %v289_v23  ;;  %v1639_v13 = vor.u32 %v1751_v5, %v1638_v4  ;;  %v1748_v23 = vld [vmem:[#allocation5 + $0x2c8] sm:$0xf0]  ;;  %v1495_v4 = vor.u32 %v1715_v26, %v1494_v24 }
 0x1b0   :  { %v295_v34 = vmul.f32 %v293_v20, %v1971_v53  ;;  %v296_v35 = vmul.f32 %v293_v20, %v1974_v54  ;;  %v297_v36 = vmul.f32 %v293_v20, %v1977_v55  ;;  %v294_v37 = vmul.f32 %v293_v20, %v1968_v52  ;;  %v1730_v53 = vld [vmem:[#allocation5 + $0x238] sm:$0xf0] }
 0x1b1   :  { %v1754_v52 = vld [vmem:[#allocation5 + $0x2f8] sm:$0xf0]  ;;  %v1555_v62 = vor.u32 %v1730_v53, %v1554_v50  ;;  %v1627_v20 = vor.u32 %v1748_v23, %v1626_v19  ;;  %v1602_v50 = vld [vmem:[#allocation5 + $0x290] sm:$0xf] }
 0x1b2   :  { %v307_v38 = vmul.f32 %v299_v25, %v294_v37  ;;  %v308_v39 = vmul.f32 %v300_v28, %v295_v34  ;;  %v309_v40 = vmul.f32 %v301_v29, %v296_v35  ;;  %v310_v41 = vmul.f32 %v302_v30, %v297_v36  ;;  %v1326_v28 = vld [vmem:[#allocation5 + $0x68] sm:$0xf]  ;;  %v1673_v29 = vld [vmem:[#allocation5 + $0x70] sm:$0xf0]  ;;  %v1742_v53 = vld [vmem:[#allocation5 + $0x298] sm:$0xf0] }
 0x1b3   :  { %v1651_v63 = vor.u32 %v1754_v52, %v1650_v51  ;;  %v1339_v25 = vor.u32 %v1676_v9, %v1338_v8  ;;  %v1531_v30 = vor.u32 %v1724_v18, %v1530_v16  ;;  %v1721_v34 = vld [vmem:[#allocation5 + $0x1f0] sm:$0xf0]  ;;  %v1614_v35 = vld [vmem:[#allocation5 + $0x2a8] sm:$0xf]  ;;  %v1327_v37 = vor.u32 %v1673_v29, %v1326_v28  ;;  %v1482_v8 = vld [vmem:[#allocation5 + $0x1a0] sm:$0xf] }
 0x1b4   :  { %v320_v43 = vadd.f32 %v312_v27, %v307_v38  ;;  %v321_v44 = vadd.f32 %v313_v31, %v308_v39  ;;  %v322_v45 = vadd.f32 %v314_v32, %v309_v40  ;;  %v323_v46 = vadd.f32 %v315_v33, %v310_v41  ;;  %v1422_v31 = vld [vmem:[#allocation5 + $0x128] sm:$0xf]  ;;  %v1697_v32 = vld [vmem:[#allocation5 + $0x130] sm:$0xf0]  ;;  %v1314_v39 = vld [vmem:[#allocation5 + $0x50] sm:$0xf]  ;;  %v219_v41 = vpop.f32.mrf.mxu0 }
 0x1b5   :  { %v1435_v27 = vor.u32 %v1700_v15, %v1434_v14  ;;  %v1518_v33 = vld [vmem:[#allocation5 + $0x1e8] sm:$0xf]  ;;  %v1745_v36 = vld [vmem:[#allocation5 + $0x2b0] sm:$0xf0]  ;;  %v1423_v38 = vor.u32 %v1697_v32, %v1422_v31  ;;  %v1670_v40 = vld [vmem:[#allocation5 + $0x58] sm:$0xf0]  ;;  %v1603_v52 = vor.u32 %v1742_v53, %v1602_v50  ;;  %v1291_v14 = vor.u32 %v1664_v3, %v1290_v2 }
 0x1b6   :  { %v324_v54 = vmax.f32 %v320_v43, 0.0  ;;  %v325_v56 = vmax.f32 %v321_v44, 0.0  ;;  %v326_v55 = vmax.f32 %v322_v45, 0.0  ;;  %v327_v57 = vmax.f32 %v323_v46, 0.0  ;;  %v1410_v45 = vld [vmem:[#allocation5 + $0x110] sm:$0xf] }
 0x1b7   :  { %v1519_v43 = vor.u32 %v1721_v34, %v1518_v33  ;;  %v1615_v44 = vor.u32 %v1745_v36, %v1614_v35  ;;  %v1694_v46 = vld [vmem:[#allocation5 + $0x118] sm:$0xf0]  ;;  %v1315_v51 = vor.u32 %v1670_v40, %v1314_v39  ;;  %v1712_v9 = vld [vmem:[#allocation5 + $0x1a8] sm:$0xf0]  ;;  %v1278_v16 = vld [vmem:[#allocation5 + $0x8] sm:$0xf] }
 0x1b8   :  { %v1999_v60 = vpack.c.bf16 %v324_v54, %v324_v54  ;;  %v2001_v61 = vpack.c.bf16 %v325_v56, %v325_v56  ;;  %v2003_v21 = vpack.c.bf16 %v326_v55, %v326_v55  ;;  %v2005_v22 = vpack.c.bf16 %v327_v57, %v327_v57  ;;  %v1302_v56 = vld [vmem:[#allocation5 + $0x38] sm:$0xf]  ;;  %v1667_v55 = vld [vmem:[#allocation5 + $0x40] sm:$0xf0]  ;;  %v1661_v18 = vld [vmem:[#allocation5 + $0x10] sm:$0xf0] }
 0x1b9   :  { %v1411_v54 = vor.u32 %v1694_v46, %v1410_v45  ;;  %v1507_v57 = vor.u32 %v1718_v49, %v1506_v47  ;;  %v1303_v0 = vor.u32 %v1667_v55, %v1302_v56  ;;  %v1483_v19 = vor.u32 %v1712_v9, %v1482_v8  ;;  %v1470_v28 = vld [vmem:[#allocation5 + $0x188] sm:$0xf]  ;;  %v1709_v29 = vld [vmem:[#allocation5 + $0x190] sm:$0xf0] }
 0x1ba   :  { %988 = vmatmul.bf16.vlgmr.msrb.gmra.mxu3 %v1999_v60  ;;  %1001 = vmatmul.bf16.vlgmr.msra.gmra.mxu0 %v2001_v61  ;;  %v1279_v31 = vor.u32 %v1661_v18, %v1278_v16  ;;  %v1471_v33 = vor.u32 %v1709_v29, %v1470_v28  ;;  %v1138_v9 = vld [vmem:[%s2052_s9] sm:$0x7] }
 0x1bb   :  { %1014 = vmatmul.bf16.vlgmr.msra.gmra.mxu1 %v2003_v21  ;;  %1027 = vmatmul.bf16.vlgmr.msra.gmra.mxu2 %v2005_v22  ;;  %v1153_v28 = vperm.slane %v1138_v9, 2 }
 0x1bc   :  { %1084 = vmatpush.bf16.msrb.mxu3 %v1363_v58  ;;  %1097 = vmatpush.bf16.msra.mxu0 %v1459_v59  ;;  %v1398_v58 = vld [vmem:[#allocation5 + $0xf8] sm:$0xf]  ;;  %v1691_v59 = vld [vmem:[#allocation5 + $0x100] sm:$0xf0] }
 0x1bd   :  { %1110 = vmatpush.bf16.msra.mxu1 %v1555_v62  ;;  %1123 = vmatpush.bf16.msra.mxu2 %v1651_v63  ;;  %v1590_v62 = vld [vmem:[#allocation5 + $0x278] sm:$0xf]  ;;  %v1739_v63 = vld [vmem:[#allocation5 + $0x280] sm:$0xf0]  ;;  %v1399_v1 = vor.u32 %v1691_v59, %v1398_v58 }
 0x1be   :  { %v1591_v5 = vor.u32 %v1739_v63, %v1590_v62 }
 0x1c0   :  { %1085 = vmatpush.bf16.msrb.mxu3 %v1351_v6  ;;  %1098 = vmatpush.bf16.msra.mxu0 %v1447_v7  ;;  %v1386_v6 = vld [vmem:[#allocation5 + $0xe0] sm:$0xf]  ;;  %v1688_v7 = vld [vmem:[#allocation5 + $0xe8] sm:$0xf0] }
 0x1c1   :  { %1111 = vmatpush.bf16.msra.mxu1 %v1543_v12  ;;  %1124 = vmatpush.bf16.msra.mxu2 %v1639_v13  ;;  %v1578_v12 = vld [vmem:[#allocation5 + $0x260] sm:$0xf]  ;;  %v1736_v13 = vld [vmem:[#allocation5 + $0x268] sm:$0xf0]  ;;  %v1387_v15 = vor.u32 %v1688_v7, %v1386_v6 }
 0x1c2   :  { %v1579_v23 = vor.u32 %v1736_v13, %v1578_v12 }
 0x1c4   :  { %1086 = vmatpush.bf16.msrb.mxu3 %v1339_v25  ;;  %1099 = vmatpush.bf16.msra.mxu0 %v1435_v27  ;;  %v1374_v25 = vld [vmem:[#allocation5 + $0xc8] sm:$0xf]  ;;  %v1685_v27 = vld [vmem:[#allocation5 + $0xd0] sm:$0xf0] }
 0x1c5   :  { %1112 = vmatpush.bf16.msra.mxu1 %v1531_v30  ;;  %1125 = vmatpush.bf16.msra.mxu2 %v1627_v20  ;;  %v1566_v30 = vld [vmem:[#allocation5 + $0x248] sm:$0xf]  ;;  %v1733_v20 = vld [vmem:[#allocation5 + $0x250] sm:$0xf0]  ;;  %v1375_v32 = vor.u32 %v1685_v27, %v1374_v25 }
 0x1c6   :  { %v1567_v34 = vor.u32 %v1733_v20, %v1566_v30 }
 0x1c8   :  { %1087 = vmatpush.bf16.msrb.mxu3 %v1327_v37  ;;  %1100 = vmatpush.bf16.msra.mxu0 %v1423_v38 }
 0x1c9   :  { %1113 = vmatpush.bf16.msra.mxu1 %v1519_v43  ;;  %1126 = vmatpush.bf16.msra.mxu2 %v1615_v44 }
 0x1ca   :  { %1040 = vmatmul.bf16.vlgmr.msra.gmra.mxu3 %v1999_v60  ;;  %1053 = vmatmul.bf16.vlgmr.msrb.gmra.mxu0 %v2001_v61 }
 0x1cb   :  { %1066 = vmatmul.bf16.vlgmr.msrb.gmra.mxu1 %v2003_v21  ;;  %1079 = vmatmul.bf16.vlgmr.msrb.gmra.mxu2 %v2005_v22 }
 0x1cc   :  { %1088 = vmatpush.bf16.msrb.mxu3 %v1315_v51  ;;  %1101 = vmatpush.bf16.msra.mxu0 %v1411_v54 }
 0x1cd   :  { %1114 = vmatpush.bf16.msra.mxu1 %v1507_v57  ;;  %1127 = vmatpush.bf16.msra.mxu2 %v1603_v52 }
 0x1d0   :  { %1089 = vmatpush.bf16.msrb.mxu3 %v1303_v0  ;;  %1102 = vmatpush.bf16.msra.mxu0 %v1399_v1 }
 0x1d1   :  { %1115 = vmatpush.bf16.msra.mxu1 %v1495_v4  ;;  %1128 = vmatpush.bf16.msra.mxu2 %v1591_v5 }
 0x1d4   :  { %1090 = vmatpush.bf16.msrb.mxu3 %v1291_v14  ;;  %1103 = vmatpush.bf16.msra.mxu0 %v1387_v15  ;;  %v1151_v14 = vperm.slane %v1138_v9, 0 }
 0x1d5   :  { %1116 = vmatpush.bf16.msra.mxu1 %v1483_v19  ;;  %1129 = vmatpush.bf16.msra.mxu2 %v1579_v23  ;;  %v1152_v19 = vperm.slane %v1138_v9, 1 }
 0x1d8   :  { %1091 = vmatpush.bf16.msrb.mxu3 %v1279_v31  ;;  %1104 = vmatpush.bf16.msra.mxu0 %v1375_v32 }
 0x1d9   :  { %1117 = vmatpush.bf16.msra.mxu1 %v1471_v33  ;;  %1130 = vmatpush.bf16.msra.mxu2 %v1567_v34 }
 0x1db   :  { %1092 = vmatmul.bf16.vlgmr.msrb.gmra.mxu3 %v1999_v60  ;;  %1105 = vmatmul.bf16.vlgmr.msra.gmra.mxu0 %v2001_v61  ;;  %v460_v60 = vld [vmem:[%s2049_s6] sm:$0x7] }
 0x1dc   :  { %1118 = vmatmul.bf16.vlgmr.msra.gmra.mxu1 %v2003_v21  ;;  %1131 = vmatmul.bf16.vlgmr.msra.gmra.mxu2 %v2005_v22  ;;  %v463_v21 = vperm.slane %v460_v60, 1  ;;  %v462_v22 = vperm.slane %v460_v60, 0  ;;  %v464_v57 = vperm.slane %v460_v60, 2 }
 0x237   :  { %v1002_v35 = vpop.f32.mrf.mxu0 }
 0x238   :  { %v1015_v36 = vpop.f32.mrf.mxu1 }
 0x23d   :  { %v989_v37 = vpop.f32.mrf.mxu3 }
 0x23e   :  { %v1028_v38 = vpop.f32.mrf.mxu2  ;;  %v990_v53 = vadd.f32 %v989_v37, %v462_v22 }
 0x23f   :  { %v1004_v39 = vpop.f32.mrf.mxu0 }
 0x240   :  { %v1017_v40 = vpop.f32.mrf.mxu1  ;;  %v1003_v55 = vadd.f32 %v1002_v35, %v990_v53 }
 0x242   :  { %v1016_v59 = vadd.f32 %v1015_v36, %v1003_v55 }
 0x244   :  { %v1029_v2 = vadd.f32 %v1028_v38, %v1016_v59 }
 0x245   :  { %v991_v41 = vpop.f32.mrf.mxu3 }
 0x246   :  { %v1030_v42 = vpop.f32.mrf.mxu2  ;;  %v1136_v41 = vld [vmem:[%s2050_s7] sm:$0x7] }
 0x247   :  { %v1054_v43 = vpop.f32.mrf.mxu0  ;;  %v1137_v42 = vld [vmem:[#allocation7] sm:$0x7] }
 0x248   :  { %v1067_v44 = vpop.f32.mrf.mxu1  ;;  %v1190_v60 = vperm.slane %v1137_v42, 0 }
 0x24d   :  { %v1041_v45 = vpop.f32.mrf.mxu3 }
 0x24e   :  { %v1080_v46 = vpop.f32.mrf.mxu2  ;;  %v1042_v48 = vadd.f32 %v1041_v45, %v463_v21  ;;  %v1181_v45 = vperm.slane %v1136_v41, 1 }
 0x24f   :  { %v1056_v47 = vpop.f32.mrf.mxu0 }
 0x250   :  { %v1069_v61 = vpop.f32.mrf.mxu1  ;;  %v1055_v54 = vadd.f32 %v1054_v43, %v1042_v48 }
 0x251   :  { %v1191_v61 = vperm.slane %v1137_v42, 1 }
 0x252   :  { %v1068_v52 = vadd.f32 %v1067_v44, %v1055_v54  ;;  %v1180_v44 = vperm.slane %v1136_v41, 0  ;;  %v1205_v54 = vld [vmem:[%s2053_s10] sm:$0x7] }
 0x254   :  { %v1081_v63 = vadd.f32 %v1080_v46, %v1068_v52  ;;  %v1182_v46 = vperm.slane %v1136_v41, 2  ;;  %v1207_v52 = vperm.slane %v1205_v54, 0 }
 0x255   :  { %v1043_v49 = vpop.f32.mrf.mxu3 }
 0x256   :  { %v1082_v50 = vpop.f32.mrf.mxu2  ;;  %v1139_v5 = vadd.f32 %v1081_v63, %v1029_v2  ;;  %v1192_v49 = vperm.slane %v1137_v42, 2 }
 0x258   :  { %v1106_v51 = vpop.f32.mrf.mxu0 }
 0x259   :  { %v1119_v56 = vpop.f32.mrf.mxu1 }
 0x25e   :  { %v1093_v58 = vpop.f32.mrf.mxu3 }
 0x25f   :  { %v1094_v24 = vadd.f32 %v1093_v58, %v464_v57  ;;  %v1132_v26 = vpop.f32.mrf.mxu2 }
 0x260   :  { %v1108_v62 = vpop.f32.mrf.mxu0 }
 0x261   :  { %v1107_v0 = vadd.f32 %v1106_v51, %v1094_v24  ;;  %v1121_v1 = vpop.f32.mrf.mxu1 }
 0x262   :  { %v1209_v1 = vperm.slane %v1205_v54, 2 }
 0x263   :  { %v1120_v3 = vadd.f32 %v1119_v56, %v1107_v0 }
 0x265   :  { %v1133_v4 = vadd.f32 %v1132_v26, %v1120_v3  ;;  %v1208_v26 = vperm.slane %v1205_v54, 1 }
 0x266   :  { %v1095_v6 = vpop.f32.mrf.mxu3 }
 0x267   :  { %v1134_v7 = vpop.f32.mrf.mxu2  ;;  %v1140_v8 = vadd.f32 %v1139_v5, %v1133_v4 }
 0x268   :  { %v1763_v7 = vld [vmem:[#allocation2] ss:$0 sm:$0xff] }
 0x269   :  { %1141 = vadd.xlane.f32.xlu1 %v1140_v8 }
 0x2dc   :  { %v1142_v12 = vpop.xlane.xlu1 %1141 }
 0x2dd   :  { %v1143_v13 = vmul.f32 0.0033333334, %v1142_v12 }
 0x2df   :  { %v1144_v15 = vsub.f32 %v1029_v2, %v1143_v13  ;;  %v1145_v16 = vsub.f32 %v1081_v63, %v1143_v13  ;;  %v1146_v18 = vsub.f32 %v1133_v4, %v1143_v13 }
 0x2e1   :  { %v1147_v23 = vmul.f32 %v1144_v15, %v1144_v15  ;;  %v1148_v25 = vmul.f32 %v1145_v16, %v1145_v16  ;;  %v1149_v27 = vmul.f32 %v1146_v18, %v1146_v18 }
 0x2e3   :  { %v1157_v29 = vmul.f32 %v1151_v14, %v1147_v23  ;;  %v1158_v30 = vmul.f32 %v1152_v19, %v1148_v25  ;;  %v1159_v20 = vmul.f32 %v1153_v28, %v1149_v27 }
 0x2e5   :  { %v1160_v31 = vadd.f32 %v1158_v30, %v1157_v29 }
 0x2e7   :  { %v1161_v32 = vadd.f32 %v1160_v31, %v1159_v20 }
 0x2e9   :  { %1162 = vadd.xlane.f32.xlu1 %v1161_v32 }
 0x35c   :  { %v1163_v33 = vpop.xlane.xlu1 %1162 }
 0x35d   :  { %v1164_v34 = vmul.f32 0.0033333334, %v1163_v33 }
 0x35f   :  { %v1165_v35 = vadd.f32 1e-05, %v1164_v34 }
 0x361   :  { %1766 = vrsqrt.f32 %v1165_v35  ;;  %vm1172_vm7 = vweird.f32 %v1165_v35 }
 0x367   :  { %v1767_v36 = vpop.eup %1766 }
 0x368   :  { %v1167_v37 = vmul.f32 %v1767_v36, %v1165_v35  ;;  %vm1173_vm6 = vweird.f32 %v1767_v36 }
 0x369   :  { %vm1174_vm8 = vmor %vm1172_vm7, %vm1173_vm6 }
 0x36a   :  { %v1168_v38 = vmul.f32 %v1767_v36, %v1167_v37 }
 0x36c   :  { %v1169_v39 = vmul.f32 0.5, %v1168_v38 }
 0x36e   :  { %v1170_v40 = vsub.f32 1.5, %v1169_v39 }
 0x370   :  { %v1171_v43 = vmul.f32 %v1767_v36, %v1170_v40 }
 0x372   :  { %v1175_v47 = vsel %vm1174_vm8, %v1767_v36, %v1171_v43 }
 0x373   :  { %v1176_v21 = vmul.f32 %v1175_v47, %v1144_v15  ;;  %v1177_v22 = vmul.f32 %v1175_v47, %v1145_v16  ;;  %v1178_v48 = vmul.f32 %v1175_v47, %v1146_v18 }
 0x375   :  { %v1186_v50 = vmul.f32 %v1180_v44, %v1176_v21  ;;  %v1187_v53 = vmul.f32 %v1181_v45, %v1177_v22  ;;  %v1188_v51 = vmul.f32 %v1182_v46, %v1178_v48 }
 0x377   :  { %v1196_v56 = vadd.f32 %v1190_v60, %v1186_v50  ;;  %v1197_v55 = vadd.f32 %v1191_v61, %v1187_v53  ;;  %v1198_v57 = vadd.f32 %v1192_v49, %v1188_v51 }
 0x379   :  { %v1199_v58 = vadd.f32 %v1196_v56, %v2011_v10  ;;  %v1200_v59 = vadd.f32 %v1197_v55, %v2013_v11  ;;  %v1201_v24 = vadd.f32 %v1198_v57, %v2015_v17 }
 0x37b   :  { %v1202_v62 = vmax.f32 %v1199_v58, 0.0  ;;  %v1203_v63 = vmax.f32 %v1200_v59, 0.0  ;;  %v1204_v0 = vmax.f32 %v1201_v24, 0.0 }
 0x37d   :  { %v1213_v2 = vmul.f32 %v1207_v52, %v1202_v62  ;;  %v1214_v3 = vmul.f32 %v1208_v26, %v1203_v63  ;;  %v1215_v4 = vmul.f32 %v1209_v1, %v1204_v0 }
 0x37f   :  { %v1216_v5 = vadd.f32 %v1214_v3, %v1213_v2 }
 0x381   :  { %v1217_v6 = vadd.f32 %v1216_v5, %v1215_v4 }
 0x383   :  { %1218 = vadd.xlane.f32.xlu2 %v1217_v6 }
 0x3f6   :  { %v1219_v8 = vpop.xlane.xlu2 %1218 }
 0x3f7   :  { %v1224_v9 = vadd.f32 %v1763_v7, %v1219_v8 }
 0x3f9   :  { %1226 = vst.msk [vmem:[%s2055_s12] sm:$0xff] %vm1225_vm9, %v1224_v9 }
 0x3fa   :  { %1231 = vsyncpa [#allocation4], 1 }
 0x3fb   :  { %1232 = vsyncpa [#allocation6], 1 }

</bundles_post_ra>
